<compile_context>
chip_gen: v7x
topology: tpu7x:2x2x1
jax: 0.10.0
libtpu: 0.0.40
codegen_flags: <defaults>
</compile_context>

<pallas_src>
import jax
import jax.numpy as jnp
from jax import lax
from jax.experimental import pallas as pl
from jax.experimental.pallas import tpu as pltpu

# TODO(synk): the pretrained HF CLIP tokenizer/encoder has no Pallas
# equivalent; its per-stage text embedding is replaced by synthetic inputs.
# TODO(synk): the module draws start/end tokens with torch.randn inside
# forward(); here they are explicit (deterministic) kernel inputs.


def _l2_normalize(t):
    # F.normalize(p=2, dim=-1): x / max(||x||, 1e-12) == x * rsqrt(max(||x||^2, 1e-24))
    ss = jnp.sum(t * t, axis=-1, keepdims=True)
    return t * lax.rsqrt(jnp.maximum(ss, 1e-24))


def _text_feature_kernel(clip_ref, w_ref, b_ref, start_ref, end_ref, out_ref):
    # clip_ref  : (Mg, text_dim)        bf16   (Mg = rows of this program)
    # w_ref     : (text_dim, latent)    bf16   (pre-transposed nn.Linear weight)
    # b_ref     : (1, latent)           f32
    # start_ref : (Mg, latent)          f32
    # end_ref   : (Mg, latent)          f32
    # out_ref   : (3, Mg, latent)       f32    [start | proj | end] slabs
    #
    # nn.Linear: y = x @ W^T + b.  One MXU matmul for every stage of every
    # text handled by this program; bf16 operands, f32 accumulation.
    proj = lax.dot_general(
        clip_ref[...], w_ref[...],
        dimension_numbers=(((1,), (0,)), ((), ())),
        preferred_element_type=jnp.float32)          # (Mg, latent)
    proj = proj + b_ref[...]                         # single hoisted bias add

    # Per-token L2 norm is row-independent: normalize and store each slab as a
    # dense, lane-wide (Mg, latent) tile (leading size-3 axis is not second-
    # minor, so no 3->8 sublane padding and no masked per-row stores).
    out_ref[0] = _l2_normalize(start_ref[...])
    out_ref[1] = _l2_normalize(proj)
    out_ref[2] = _l2_normalize(end_ref[...])


def text_feature_forward(clip_feats, weight, bias, start_tokens, end_tokens):
    """Pallas implementation of TextFeature.forward (with synthetic CLIP feats).

    Args:
      clip_feats:   (B, S, text_dim)       per-stage CLIP text embeddings
      weight:       (latent_dim, text_dim) nn.Linear weight
      bias:         (latent_dim,)          nn.Linear bias
      start_tokens: (B, S, latent_dim)
      end_tokens:   (B, S, latent_dim)
    Returns:
      (B, 3*S, latent_dim) L2-normalized token features.
    """
    B, S, text_dim = clip_feats.shape
    latent_dim = weight.shape[0]
    M = B * S

    # Grid: single step by default (kernel is latency-bound at small shapes and
    # v5e/v6e have a single TensorCore).  Only split 2-way (v7x megacore) when
    # each core gets a dense, meaningful matmul tile: >=128 rows, multiple of 8
    # (keeps input/output blocks sublane-aligned and stores unmasked).
    G = 2 if (B % 2 == 0 and ((B // 2) * S) % 8 == 0 and (B // 2) * S >= 128) else 1
    Mg = M // G

    # Wrapper-side layout plumbing (free / folded by XLA):
    #   - flatten (B, S) so the kernel never reshapes across the S=3 axis
    #   - pre-transpose the constant weight so the MXU RHS is fed natively
    clip_flat = clip_feats.reshape(M, text_dim).astype(jnp.bfloat16)
    w_t = jnp.asarray(weight, jnp.bfloat16).T                 # (text_dim, latent)
    b2 = jnp.asarray(bias, jnp.float32).reshape(1, latent_dim)
    start_flat = start_tokens.reshape(M, latent_dim).astype(jnp.float32)
    end_flat = end_tokens.reshape(M, latent_dim).astype(jnp.float32)

    grid_spec = pltpu.PrefetchScalarGridSpec(
        num_scalar_prefetch=0,
        grid=(G,),
        in_specs=[
            pl.BlockSpec((Mg, text_dim), lambda g: (g, 0)),
            pl.BlockSpec((text_dim, latent_dim), lambda g: (0, 0)),
            pl.BlockSpec((1, latent_dim), lambda g: (0, 0)),
            pl.BlockSpec((Mg, latent_dim), lambda g: (g, 0)),
            pl.BlockSpec((Mg, latent_dim), lambda g: (g, 0)),
        ],
        out_specs=pl.BlockSpec((3, Mg, latent_dim), lambda g: (0, g, 0)),
    )

    out3 = pl.pallas_call(
        _text_feature_kernel,
        out_shape=jax.ShapeDtypeStruct((3, M, latent_dim), jnp.float32),
        grid_spec=grid_spec,
        compiler_params=pltpu.CompilerParams(
            dimension_semantics=("parallel",)),
    )(clip_flat, w_t, b2, start_flat, end_flat)

    # (3, B*S, L) -> (B, S, 3, L) -> (B, 3*S, L): recovers the module's
    # per-stage [start, proj, end] interleaving.  Pure wrapper-side layout
    # work on a tiny array; kept out of the kernel so its stores stay dense.
    out = out3.reshape(3, B, S, latent_dim).transpose(1, 2, 0, 3)
    return out.reshape(B, 3 * S, latent_dim)


def _reference_forward(clip_feats, weight, bias, start_tokens, end_tokens):
    """Pure-JAX reference (matmul inputs quantized to bf16 like the kernel)."""
    cf = clip_feats.astype(jnp.bfloat16).astype(jnp.float32)
    w = jnp.asarray(weight, jnp.bfloat16).astype(jnp.float32)
    proj = jnp.einsum("bsd,ld->bsl", cf, w,
                      precision=lax.Precision.HIGHEST) + bias          # (B,S,L)
    toks = jnp.stack([start_tokens, proj, end_tokens], axis=2)         # (B,S,3,L)
    B, S, _, L = toks.shape
    toks = toks.reshape(B, 3 * S, L)
    norm = jnp.sqrt(jnp.sum(toks * toks, axis=-1, keepdims=True))
    return toks / jnp.maximum(norm, 1e-12)


if __name__ == "__main__":
    # Small shapes consistent with the module defaults.
    B = 2            # batch of texts (len(text_con))
    S = 3            # number of stages per text (text.split('.'))
    text_dim = 512   # CLIP text feature dim
    latent_dim = 256 # projection dim

    key = jax.random.PRNGKey(0)
    k_clip, k_w, k_b, k_start, k_end = jax.random.split(key, 5)

    # Synthetic stand-in for CLIP get_text_features per stage.
    clip_feats = jax.random.normal(k_clip, (B, S, text_dim), jnp.float32)
    # nn.Linear(text_dim, latent_dim) parameters (deterministic init).
    weight = jax.random.normal(k_w, (latent_dim, text_dim), jnp.float32) * 0.02
    bias = jax.random.normal(k_b, (latent_dim,), jnp.float32) * 0.02
    # Per-stage start / end tokens (torch.randn equivalents).
    start_tokens = jax.random.normal(k_start, (B, S, latent_dim), jnp.float32)
    end_tokens = jax.random.normal(k_end, (B, S, latent_dim), jnp.float32)

    out = text_feature_forward(clip_feats, weight, bias, start_tokens, end_tokens)
    out = jax.block_until_ready(out)

    ref = _reference_forward(clip_feats, weight, bias, start_tokens, end_tokens)
    assert out.shape == (B, 3 * S, latent_dim), out.shape
    # Tolerance slightly above 1e-5: kernel and reference compute identical
    # bf16-quantized products with f32 accumulation; only summation order differs.
    max_err = float(jnp.max(jnp.abs(out - ref)))
    assert jnp.allclose(out, ref, atol=2e-5, rtol=2e-5), max_err

    print("KERNEL_OK")
</pallas_src>

<mosaic_0001>
module attributes {stable_mosaic.version = 11 : i64} {
  func.func @_text_feature_kernel(%arg0: i32, %arg1: memref<6x512xbf16, #tpu.memory_space<vmem>>, %arg2: memref<512x256xbf16, #tpu.memory_space<vmem>>, %arg3: memref<1x256xf32, #tpu.memory_space<vmem>>, %arg4: memref<6x256xf32, #tpu.memory_space<vmem>>, %arg5: memref<6x256xf32, #tpu.memory_space<vmem>>, %arg6: memref<3x6x256xf32, #tpu.memory_space<vmem>>) attributes {dimension_semantics = [#tpu.dimension_semantics<parallel>], iteration_bounds = array<i64: 1>, scalar_prefetch = 0 : i64, scratch_operands = 0 : i64, tpu.core_type = #tpu.core_type<tc>, window_params = [{transform_indices = @transform_0, window_bounds = array<i64: 6, 512>}, {pipeline_mode = #tpu.pipeline_mode<synchronous>, transform_indices = @transform_1, window_bounds = array<i64: 512, 256>}, {pipeline_mode = #tpu.pipeline_mode<synchronous>, transform_indices = @transform_2, window_bounds = array<i64: 1, 256>}, {transform_indices = @transform_3, window_bounds = array<i64: 6, 256>}, {transform_indices = @transform_4, window_bounds = array<i64: 6, 256>}, {transform_indices = @transform_5, window_bounds = array<i64: 3, 6, 256>}]} {
    %c0 = arith.constant 0 : index
    %c0_0 = arith.constant 0 : index
    %0 = vector.load %arg1[%c0, %c0_0] : memref<6x512xbf16, #tpu.memory_space<vmem>>, vector<6x512xbf16>
    %c0_1 = arith.constant 0 : index
    %c0_2 = arith.constant 0 : index
    %1 = vector.load %arg2[%c0_1, %c0_2] : memref<512x256xbf16, #tpu.memory_space<vmem>>, vector<512x256xbf16>
    %cst = arith.constant dense<0.000000e+00> : vector<6x256xf32>
    %2 = tpu.matmul %0, %1, %cst {dimension_numbers = #tpu.dot_dimension_numbers<[1], [0], [0], [1], [0, 0, 1, 1], [], []>} : vector<6x512xbf16>, vector<512x256xbf16>, vector<6x256xf32> -> vector<6x256xf32>
    %c0_3 = arith.constant 0 : index
    %c0_4 = arith.constant 0 : index
    %3 = vector.load %arg3[%c0_3, %c0_4] : memref<1x256xf32, #tpu.memory_space<vmem>>, vector<1x256xf32>
    %4 = vector.broadcast %3 : vector<1x256xf32> to vector<6x256xf32>
    %5 = arith.addf %2, %4 : vector<6x256xf32>
    %c0_5 = arith.constant 0 : index
    %c0_6 = arith.constant 0 : index
    %6 = vector.load %arg4[%c0_5, %c0_6] : memref<6x256xf32, #tpu.memory_space<vmem>>, vector<6x256xf32>
    %7 = arith.mulf %6, %6 : vector<6x256xf32>
    %cst_7 = arith.constant dense<0.000000e+00> : vector<6xf32>
    %8 = vector.multi_reduction <add>, %7, %cst_7 [1] : vector<6x256xf32> to vector<6xf32>
    %9 = vector.shape_cast %8 : vector<6xf32> to vector<6x1xf32>
    %cst_8 = arith.constant 1.000000e-24 : f32
    %10 = vector.broadcast %cst_8 : f32 to vector<6x1xf32>
    %11 = arith.maximumf %9, %10 : vector<6x1xf32>
    %12 = math.rsqrt %11 : vector<6x1xf32>
    %13 = vector.broadcast %12 : vector<6x1xf32> to vector<6x256xf32>
    %14 = arith.mulf %6, %13 : vector<6x256xf32>
    %c0_9 = arith.constant 0 : index
    %c0_10 = arith.constant 0 : index
    %c0_11 = arith.constant 0 : index
    %15 = vector.load %arg6[%c0_9, %c0_10, %c0_11] : memref<3x6x256xf32, #tpu.memory_space<vmem>>, vector<1x6x256xf32>
    %16 = vector.shape_cast %15 : vector<1x6x256xf32> to vector<6x256xf32>
    %17 = vector.shape_cast %14 : vector<6x256xf32> to vector<1x6x256xf32>
    tpu.vector_store %arg6[%c0_9, %c0_10, %c0_11], %17 {strides = array<i32>} : memref<3x6x256xf32, #tpu.memory_space<vmem>>, vector<1x6x256xf32>,
    %18 = arith.mulf %5, %5 : vector<6x256xf32>
    %cst_12 = arith.constant dense<0.000000e+00> : vector<6xf32>
    %19 = vector.multi_reduction <add>, %18, %cst_12 [1] : vector<6x256xf32> to vector<6xf32>
    %20 = vector.shape_cast %19 : vector<6xf32> to vector<6x1xf32>
    %cst_13 = arith.constant 1.000000e-24 : f32
    %21 = vector.broadcast %cst_13 : f32 to vector<6x1xf32>
    %22 = arith.maximumf %20, %21 : vector<6x1xf32>
    %23 = math.rsqrt %22 : vector<6x1xf32>
    %24 = vector.broadcast %23 : vector<6x1xf32> to vector<6x256xf32>
    %25 = arith.mulf %5, %24 : vector<6x256xf32>
    %c1 = arith.constant 1 : index
    %c0_14 = arith.constant 0 : index
    %c0_15 = arith.constant 0 : index
    %26 = vector.load %arg6[%c1, %c0_14, %c0_15] : memref<3x6x256xf32, #tpu.memory_space<vmem>>, vector<1x6x256xf32>
    %27 = vector.shape_cast %26 : vector<1x6x256xf32> to vector<6x256xf32>
    %28 = vector.shape_cast %25 : vector<6x256xf32> to vector<1x6x256xf32>
    tpu.vector_store %arg6[%c1, %c0_14, %c0_15], %28 {strides = array<i32>} : memref<3x6x256xf32, #tpu.memory_space<vmem>>, vector<1x6x256xf32>,
    %c0_16 = arith.constant 0 : index
    %c0_17 = arith.constant 0 : index
    %29 = vector.load %arg5[%c0_16, %c0_17] : memref<6x256xf32, #tpu.memory_space<vmem>>, vector<6x256xf32>
    %30 = arith.mulf %29, %29 : vector<6x256xf32>
    %cst_18 = arith.constant dense<0.000000e+00> : vector<6xf32>
    %31 = vector.multi_reduction <add>, %30, %cst_18 [1] : vector<6x256xf32> to vector<6xf32>
    %32 = vector.shape_cast %31 : vector<6xf32> to vector<6x1xf32>
    %cst_19 = arith.constant 1.000000e-24 : f32
    %33 = vector.broadcast %cst_19 : f32 to vector<6x1xf32>
    %34 = arith.maximumf %32, %33 : vector<6x1xf32>
    %35 = math.rsqrt %34 : vector<6x1xf32>
    %36 = vector.broadcast %35 : vector<6x1xf32> to vector<6x256xf32>
    %37 = arith.mulf %29, %36 : vector<6x256xf32>
    %c2 = arith.constant 2 : index
    %c0_20 = arith.constant 0 : index
    %c0_21 = arith.constant 0 : index
    %38 = vector.load %arg6[%c2, %c0_20, %c0_21] : memref<3x6x256xf32, #tpu.memory_space<vmem>>, vector<1x6x256xf32>
    %39 = vector.shape_cast %38 : vector<1x6x256xf32> to vector<6x256xf32>
    %40 = vector.shape_cast %37 : vector<6x256xf32> to vector<1x6x256xf32>
    tpu.vector_store %arg6[%c2, %c0_20, %c0_21], %40 {strides = array<i32>} : memref<3x6x256xf32, #tpu.memory_space<vmem>>, vector<1x6x256xf32>,
    return
  }
  func.func @transform_0(%arg0: i32) -> (i32, i32) {
    %c0_i32 = arith.constant 0 : i32
    %c0_i32_0 = arith.constant 0 : i32
    return %arg0, %c0_i32 : i32, i32
  }
  func.func @transform_1(%arg0: i32) -> (i32, i32) {
    %c0_i32 = arith.constant 0 : i32
    %c0_i32_0 = arith.constant 0 : i32
    %c0_i32_1 = arith.constant 0 : i32
    return %c0_i32, %c0_i32_0 : i32, i32
  }
  func.func @transform_2(%arg0: i32) -> (i32, i32) {
    %c0_i32 = arith.constant 0 : i32
    %c0_i32_0 = arith.constant 0 : i32
    %c0_i32_1 = arith.constant 0 : i32
    return %c0_i32, %c0_i32_0 : i32, i32
  }
  func.func @transform_3(%arg0: i32) -> (i32, i32) {
    %c0_i32 = arith.constant 0 : i32
    %c0_i32_0 = arith.constant 0 : i32
    return %arg0, %c0_i32 : i32, i32
  }
  func.func @transform_4(%arg0: i32) -> (i32, i32) {
    %c0_i32 = arith.constant 0 : i32
    %c0_i32_0 = arith.constant 0 : i32
    return %arg0, %c0_i32 : i32, i32
  }
  func.func @transform_5(%arg0: i32) -> (i32, i32, i32) {
    %c0_i32 = arith.constant 0 : i32
    %c0_i32_0 = arith.constant 0 : i32
    %c0_i32_1 = arith.constant 0 : i32
    return %c0_i32, %arg0, %c0_i32_0 : i32, i32, i32
  }
}

</mosaic_0001>

<bundles_post_ra>
// kernel: tpu_custom_call.1
= control target key start
LH: loop header
LB: loop body
LE: loop exit
PB: predicated region body
PF: predicated region fallthrough
CT: control target
= control target key end

     0   :  { %10 = vsyncpa [#allocation3], 0  ;;  %s1042_s0 = inlined_call_operand.hbm [shape: bf16[6,512], index: 0, kind: input, shape index: {}]   ;;  %s1043_s1 = inlined_call_operand.hbm [shape: bf16[512,256], index: 1, kind: input, shape index: {}]   ;;  %s1044_s2 = inlined_call_operand.vmem [shape: f32[1,256], index: 2, kind: input, shape index: {}]   ;;  %s1045_s3 = inlined_call_operand.hbm [shape: f32[6,256], index: 3, kind: input, shape index: {}]   ;;  %s1046_s4 = inlined_call_operand.hbm [shape: f32[6,256], index: 4, kind: input, shape index: {}]   ;;  %s1047_s5 = inlined_call_operand.hbm [shape: f32[3,6,256], index: 5, kind: output, shape index: {}]  }
   0x1   :  { %11 = vsyncpa [#allocation6], 0 }
   0x2   :  { %12 = vsyncpa [#allocation9], 0 }
   0x3   :  { %13 = vsyncpa [#allocation4], 0  ;;  %s934_s18 = smov [#allocation5]   ;;  %s816_s22 = scalar_lea.hbm %s1043_s1, 8192 }
   0x4   :  { %s29_s19 = sshll.u32 %s934_s18, 4  ;;  %p817_p0 = scmp.ne.s32.totalorder %s1043_s1, %s816_s22  ;;  %s30_s19 = int_to_ptr.vmem [resolvable:$true] %s29_s19 }
   0x5   :  { %p820_p1 = scmp.lt.u32.totalorder %s816_s22, %s1043_s1 }
   0x7   :  { %p822_p2 = pnand %p820_p1, %p817_p0 }
   0x9   :  { %825 = shalt.err (!%p822_p2)
}
   0xa   :  { %s826_s27 = scalar_lea.vmem %s30_s19, 8192  ;;  %p831_p4 = scmp.lt.s32.totalorder %s30_s19, %s30_s19 }
   0xb   :  { %p827_p3 = scmp.ne.s32.totalorder %s30_s19, %s826_s27  ;;  %p832_p5 = scmp.lt.s32.totalorder %s826_s27, %s826_s27 }
   0xd   :  { %p833_p6 = por %p832_p5, %p831_p4 }
   0xf   :  { %p834_p7 = pnand %p833_p6, %p827_p3 }
  0x11   :  { %837 = shalt.err (!%p834_p7)
}
  0x12   :  { %s935_s28 = smov 128   ;;  %s936_s29 = smov 8  }
  0x13   :  { %35 = dma.hbm_to_vmem [thread:$0]  %s1043_s1, 8192, %s30_s19, [#allocation6], %s935_s28, %s935_s28, %s936_s29  }
  0x14   :  { %s937_s7 = smov [#allocation2]   ;;  %s938_s9 = smov [#allocation7]  }
  0x15   :  { %s20_s8 = sshll.u32 %s937_s7, 4  ;;  %s44_s10 = sshll.u32 %s938_s9, 4  ;;  %s21_s8 = int_to_ptr.vmem [resolvable:$true] %s20_s8  ;;  %s45_s10 = int_to_ptr.vmem [resolvable:$true] %s44_s10 }
  0x16   :  { %s838_s13 = scalar_lea.hbm %s1042_s0, 256 }
  0x17   :  { %p839_p8 = scmp.ne.s32.totalorder %s1042_s0, %s838_s13  ;;  %p842_p9 = scmp.lt.u32.totalorder %s838_s13, %s1042_s0 }
  0x19   :  { %p844_p10 = pnand %p842_p9, %p839_p8 }
  0x1b   :  { %847 = shalt.err (!%p844_p10)
}
  0x1c   :  { %s848_s1 = scalar_lea.vmem %s21_s8, 256  ;;  %p853_p12 = scmp.lt.s32.totalorder %s21_s8, %s21_s8 }
  0x1d   :  { %p849_p11 = scmp.ne.s32.totalorder %s21_s8, %s848_s1  ;;  %p854_p13 = scmp.lt.s32.totalorder %s848_s1, %s848_s1 }
  0x1f   :  { %p855_p0 = por %p854_p13, %p853_p12 }
  0x21   :  { %p856_p1 = pnand %p855_p0, %p849_p11 }
  0x23   :  { %859 = shalt.err (!%p856_p1)
}
  0x24   :  { %23 = dma.hbm_to_vmem [thread:$0]  %s1042_s0, 256, %s21_s8, [#allocation3]  }
  0x25   :  { %s860_s22 = scalar_lea.hbm %s1045_s3, 256 }
  0x26   :  { %p861_p2 = scmp.ne.s32.totalorder %s1045_s3, %s860_s22  ;;  %p864_p3 = scmp.lt.u32.totalorder %s860_s22, %s1045_s3 }
  0x28   :  { %p866_p4 = pnand %p864_p3, %p861_p2 }
  0x2a   :  { %869 = shalt.err (!%p866_p4)
}
  0x2b   :  { %s870_s27 = scalar_lea.vmem %s45_s10, 256  ;;  %p875_p6 = scmp.lt.s32.totalorder %s45_s10, %s45_s10 }
  0x2c   :  { %p871_p5 = scmp.ne.s32.totalorder %s45_s10, %s870_s27  ;;  %p876_p7 = scmp.lt.s32.totalorder %s870_s27, %s870_s27 }
  0x2e   :  { %p877_p8 = por %p876_p7, %p875_p6 }
  0x30   :  { %p878_p9 = pnand %p877_p8, %p871_p5 }
  0x32   :  { %881 = shalt.err (!%p878_p9)
}
  0x33   :  { %47 = dma.hbm_to_vmem [thread:$0]  %s1045_s3, 256, %s45_s10, [#allocation6]  }
  0x34   :  { %s939_s29 = smov [#allocation8]   ;;  %s882_s8 = scalar_lea.hbm %s1046_s4, 256 }
  0x35   :  { %s54_s30 = sshll.u32 %s939_s29, 4  ;;  %p883_p10 = scmp.ne.s32.totalorder %s1046_s4, %s882_s8  ;;  %s55_s30 = int_to_ptr.vmem [resolvable:$true] %s54_s30 }
  0x36   :  { %p886_p11 = scmp.lt.u32.totalorder %s882_s8, %s1046_s4 }
  0x38   :  { %p888_p12 = pnand %p886_p11, %p883_p10 }
  0x3a   :  { %891 = shalt.err (!%p888_p12)
}
  0x3b   :  { %s892_s14 = scalar_lea.vmem %s55_s30, 256  ;;  %p897_p0 = scmp.lt.s32.totalorder %s55_s30, %s55_s30 }
  0x3c   :  { %p893_p13 = scmp.ne.s32.totalorder %s55_s30, %s892_s14  ;;  %p898_p1 = scmp.lt.s32.totalorder %s892_s14, %s892_s14 }
  0x3e   :  { %p899_p2 = por %p898_p1, %p897_p0 }
  0x40   :  { %p900_p3 = pnand %p899_p2, %p893_p13 }
  0x42   :  { %903 = shalt.err (!%p900_p3)
}
  0x43   :  { %57 = dma.hbm_to_vmem [thread:$0]  %s1046_s4, 256, %s55_s30, [#allocation9]  }
  0x44   :  { %926 = dma.done.wait [#allocation3], 256  }
  0x45   :  { %927 = vsyncadd [#allocation3], 4294967040 }
  0x46   :  { %928 = dma.done.wait [#allocation6], 8448  }
  0x47   :  { %929 = vsyncadd [#allocation6], 4294958848 }
  0x48   :  { %930 = dma.done.wait [#allocation9], 256  }
  0x49   :  { %931 = vsyncadd [#allocation9], 4294967040  ;;  %v710_v0 = vld [vmem:[#allocation5 + $0x4] ss:$8 sps:$4 sm:$0xff]   ;;  %v714_v2 = vld [vmem:[#allocation5] ss:$8 sps:$4 sm:$0xff]  }
  0x4a   :  { %v712_v1 = vld [vmem:[#allocation5 + $0x104] ss:$8 sps:$4 sm:$0xff]   ;;  %482 = vmatprep.subr.bf16.mxu1 %v710_v0  ;;  %v715_v3 = vld [vmem:[#allocation5 + $0x100] ss:$8 sps:$4 sm:$0xff]   ;;  %v716_v4 = vld [vmem:[#allocation5 + $0x14] ss:$8 sps:$4 sm:$0xff]  }
  0x4b   :  { %523 = vmatprep.subr.bf16.mxu0 %v712_v1  ;;  %483 = vmatpush1.bf16.msra.mxu1 %v714_v2  ;;  %v718_v5 = vld [vmem:[#allocation5 + $0x114] ss:$8 sps:$4 sm:$0xff]   ;;  %v720_v6 = vld [vmem:[#allocation5 + $0x10] ss:$8 sps:$4 sm:$0xff]   ;;  %v722_v8 = vld [vmem:[#allocation5 + $0x24] ss:$8 sps:$4 sm:$0xff]  }
  0x4c   :  { %524 = vmatpush1.bf16.msra.mxu0 %v715_v3  ;;  %484 = vmatprep.subr.bf16.mxu1 %v716_v4  ;;  %v721_v7 = vld [vmem:[#allocation5 + $0x110] ss:$8 sps:$4 sm:$0xff]   ;;  %v724_v9 = vld [vmem:[#allocation5 + $0x124] ss:$8 sps:$4 sm:$0xff]   ;;  %v726_v10 = vld [vmem:[#allocation5 + $0x20] ss:$8 sps:$4 sm:$0xff]  }
  0x4d   :  { %525 = vmatprep.subr.bf16.mxu0 %v718_v5  ;;  %v727_v11 = vld [vmem:[#allocation5 + $0x120] ss:$8 sps:$4 sm:$0xff]   ;;  %v728_v12 = vld [vmem:[#allocation5 + $0x34] ss:$8 sps:$4 sm:$0xff]   ;;  %v732_v14 = vld [vmem:[#allocation5 + $0x30] ss:$8 sps:$4 sm:$0xff]  }
  0x4e   :  { %v730_v13 = vld [vmem:[#allocation5 + $0x134] ss:$8 sps:$4 sm:$0xff]   ;;  %v733_v15 = vld [vmem:[#allocation5 + $0x130] ss:$8 sps:$4 sm:$0xff]   ;;  %v734_v16 = vld [vmem:[#allocation5 + $0x44] ss:$8 sps:$4 sm:$0xff]  }
  0x4f   :  { %485 = vmatpush1.bf16.msra.mxu1 %v720_v6  ;;  %v736_v17 = vld [vmem:[#allocation5 + $0x144] ss:$8 sps:$4 sm:$0xff]   ;;  %v738_v18 = vld [vmem:[#allocation5 + $0x40] ss:$8 sps:$4 sm:$0xff]   ;;  %v740_v20 = vld [vmem:[#allocation5 + $0x54] ss:$8 sps:$4 sm:$0xff]  }
  0x50   :  { %526 = vmatpush1.bf16.msra.mxu0 %v721_v7  ;;  %486 = vmatprep.subr.bf16.mxu1 %v722_v8  ;;  %v739_v19 = vld [vmem:[#allocation5 + $0x140] ss:$8 sps:$4 sm:$0xff]   ;;  %v742_v21 = vld [vmem:[#allocation5 + $0x154] ss:$8 sps:$4 sm:$0xff]   ;;  %v744_v22 = vld [vmem:[#allocation5 + $0x50] ss:$8 sps:$4 sm:$0xff]  }
  0x51   :  { %527 = vmatprep.subr.bf16.mxu0 %v724_v9  ;;  %v745_v23 = vld [vmem:[#allocation5 + $0x150] ss:$8 sps:$4 sm:$0xff]   ;;  %v746_v24 = vld [vmem:[#allocation5 + $0x64] ss:$8 sps:$4 sm:$0xff]   ;;  %v750_v26 = vld [vmem:[#allocation5 + $0x60] ss:$8 sps:$4 sm:$0xff]  }
  0x52   :  { %v748_v25 = vld [vmem:[#allocation5 + $0x164] ss:$8 sps:$4 sm:$0xff]   ;;  %v751_v27 = vld [vmem:[#allocation5 + $0x160] ss:$8 sps:$4 sm:$0xff]   ;;  %v752_v28 = vld [vmem:[#allocation5 + $0x74] ss:$8 sps:$4 sm:$0xff]  }
  0x53   :  { %487 = vmatpush1.bf16.msra.mxu1 %v726_v10  ;;  %v754_v29 = vld [vmem:[#allocation5 + $0x174] ss:$8 sps:$4 sm:$0xff]   ;;  %v756_v30 = vld [vmem:[#allocation5 + $0x70] ss:$8 sps:$4 sm:$0xff]   ;;  %v758_v32 = vld [vmem:[#allocation5 + $0x84] ss:$8 sps:$4 sm:$0xff]  }
  0x54   :  { %528 = vmatpush1.bf16.msra.mxu0 %v727_v11  ;;  %488 = vmatprep.subr.bf16.mxu1 %v728_v12  ;;  %v757_v31 = vld [vmem:[#allocation5 + $0x170] ss:$8 sps:$4 sm:$0xff]   ;;  %v760_v33 = vld [vmem:[#allocation5 + $0x184] ss:$8 sps:$4 sm:$0xff]   ;;  %v762_v34 = vld [vmem:[#allocation5 + $0x80] ss:$8 sps:$4 sm:$0xff]  }
  0x55   :  { %529 = vmatprep.subr.bf16.mxu0 %v730_v13  ;;  %v763_v35 = vld [vmem:[#allocation5 + $0x180] ss:$8 sps:$4 sm:$0xff]   ;;  %v764_v36 = vld [vmem:[#allocation5 + $0x94] ss:$8 sps:$4 sm:$0xff]   ;;  %v768_v38 = vld [vmem:[#allocation5 + $0x90] ss:$8 sps:$4 sm:$0xff]  }
  0x56   :  { %v766_v37 = vld [vmem:[#allocation5 + $0x194] ss:$8 sps:$4 sm:$0xff]   ;;  %v769_v39 = vld [vmem:[#allocation5 + $0x190] ss:$8 sps:$4 sm:$0xff]   ;;  %v770_v40 = vld [vmem:[#allocation5 + $0xa4] ss:$8 sps:$4 sm:$0xff]  }
  0x57   :  { %489 = vmatpush1.bf16.msra.mxu1 %v732_v14  ;;  %v772_v41 = vld [vmem:[#allocation5 + $0x1a4] ss:$8 sps:$4 sm:$0xff]   ;;  %v774_v42 = vld [vmem:[#allocation5 + $0xa0] ss:$8 sps:$4 sm:$0xff]   ;;  %v776_v44 = vld [vmem:[#allocation5 + $0xb4] ss:$8 sps:$4 sm:$0xff]  }
  0x58   :  { %530 = vmatpush1.bf16.msra.mxu0 %v733_v15  ;;  %490 = vmatprep.subr.bf16.mxu1 %v734_v16  ;;  %v775_v43 = vld [vmem:[#allocation5 + $0x1a0] ss:$8 sps:$4 sm:$0xff]   ;;  %v778_v45 = vld [vmem:[#allocation5 + $0x1b4] ss:$8 sps:$4 sm:$0xff]   ;;  %v780_v49 = vld [vmem:[#allocation5 + $0xb0] ss:$8 sps:$4 sm:$0xff]  }
  0x59   :  { %531 = vmatprep.subr.bf16.mxu0 %v736_v17  ;;  %v70_v46 = vld [vmem:[#allocation2] sm:$0x77]  ;;  %v71_v48 = vld [vmem:[#allocation2 + $0x8] sm:$0x77]  ;;  %v782_v52 = vld [vmem:[#allocation5 + $0xc4] ss:$8 sps:$4 sm:$0xff]  }
  0x5a   :  { %v630_v47 = vcombine.high %v70_v46, %v70_v46  ;;  %v781_v50 = vld [vmem:[#allocation5 + $0x1b0] ss:$8 sps:$4 sm:$0xff]   ;;  %v632_v51 = vcombine.high %v71_v48, %v71_v48  ;;  %v784_v53 = vld [vmem:[#allocation5 + $0x1c4] ss:$8 sps:$4 sm:$0xff]   ;;  %v786_v54 = vld [vmem:[#allocation5 + $0xc0] ss:$8 sps:$4 sm:$0xff]   ;;  %v629_v4 = vcombine.low %v70_v46, %v70_v46  ;;  %v631_v5 = vcombine.low %v71_v48, %v71_v48 }
  0x5b   :  { %491 = vmatpush1.bf16.msra.mxu1 %v738_v18  ;;  %v787_v55 = vld [vmem:[#allocation5 + $0x1c0] ss:$8 sps:$4 sm:$0xff]   ;;  %v788_v56 = vld [vmem:[#allocation5 + $0xd4] ss:$8 sps:$4 sm:$0xff]   ;;  %v792_v58 = vld [vmem:[#allocation5 + $0xd0] ss:$8 sps:$4 sm:$0xff]  }
  0x5c   :  { %532 = vmatpush1.bf16.msra.mxu0 %v739_v19  ;;  %492 = vmatprep.subr.bf16.mxu1 %v740_v20  ;;  %v790_v57 = vld [vmem:[#allocation5 + $0x1d4] ss:$8 sps:$4 sm:$0xff]   ;;  %v793_v59 = vld [vmem:[#allocation5 + $0x1d0] ss:$8 sps:$4 sm:$0xff]   ;;  %v794_v60 = vld [vmem:[#allocation5 + $0xe4] ss:$8 sps:$4 sm:$0xff]   ;;  %v138_v20 = vlaneseq }
  0x5d   :  { %533 = vmatprep.subr.bf16.mxu0 %v742_v21  ;;  %514 = vmatprep.mubr.bf16.mxu1 %v630_v47  ;;  %v796_v61 = vld [vmem:[#allocation5 + $0x1e4] ss:$8 sps:$4 sm:$0xff]   ;;  %v798_v62 = vld [vmem:[#allocation5 + $0xe0] ss:$8 sps:$4 sm:$0xff]   ;;  %v800_v0 = vld [vmem:[#allocation5 + $0xf4] ss:$8 sps:$4 sm:$0xff]  }
  0x5e   :  { %555 = vmatprep.mubr.bf16.mxu0 %v632_v51  ;;  %v799_v63 = vld [vmem:[#allocation5 + $0x1e0] ss:$8 sps:$4 sm:$0xff]   ;;  %v802_v1 = vld [vmem:[#allocation5 + $0x1f4] ss:$8 sps:$4 sm:$0xff]   ;;  %v804_v2 = vld [vmem:[#allocation5 + $0xf0] ss:$8 sps:$4 sm:$0xff]  }
  0x5f   :  { %493 = vmatpush1.bf16.msra.mxu1 %v744_v22  ;;  %v805_v3 = vld [vmem:[#allocation5 + $0x1f0] ss:$8 sps:$4 sm:$0xff]   ;;  %v564_v6 = vld [vmem:[#allocation7] sm:$0x3f]  ;;  %v565_v7 = vld [vmem:[#allocation7 + $0x8] sm:$0x3f] }
  0x60   :  { %534 = vmatpush1.bf16.msra.mxu0 %v745_v23  ;;  %494 = vmatprep.subr.bf16.mxu1 %v746_v24  ;;  %v566_v8 = vmul.f32 %v564_v6, %v564_v6  ;;  %v567_v9 = vmul.f32 %v565_v7, %v565_v7  ;;  %vm568_vm0 = vcmask 1045504   ;;  %v594_v13 = vld [vmem:[#allocation8] sm:$0x3f]  ;;  %v595_v14 = vld [vmem:[#allocation8 + $0x8] sm:$0x3f]  ;;  %v139_v21 = vshrl.u32 %v138_v20, 7 }
  0x61   :  { %535 = vmatprep.subr.bf16.mxu0 %v748_v25  ;;  %v596_v15 = vmul.f32 %v594_v13, %v594_v13  ;;  %v597_v16 = vmul.f32 %v595_v14, %v595_v14  ;;  %v136_v23 = vld [vmem:[%s1044_s2] sm:$0x3]  ;;  %s940_s2 = smov [#allocation10]  }
  0x62   :  { %v569_v10 = vsel %vm568_vm0, %v566_v8, 0.0  ;;  %v570_v11 = vsel %vm568_vm0, %v567_v9, 0.0  ;;  %v140_v22 = vsub.s32 0, %v139_v21  ;;  %v144_v24 = vsub.s32 1, %v139_v21  ;;  %s615_s16 = sshll.u32 %s940_s2, 4  ;;  %s616_s16 = int_to_ptr.vmem [resolvable:$true] %s615_s16 }
  0x63   :  { %495 = vmatpush1.bf16.msra.mxu1 %v750_v26  ;;  %v571_v12 = vadd.f32 %v570_v11, %v569_v10  ;;  %v598_v17 = vsel %vm568_vm0, %v596_v15, 0.0  ;;  %v599_v18 = vsel %vm568_vm0, %v597_v16, 0.0  ;;  %s904_s17 = scalar_lea.vmem %s616_s16, 768  ;;  %p909_p5 = scmp.lt.s32.totalorder %s616_s16, %s616_s16 }
  0x64   :  { %536 = vmatpush1.bf16.msra.mxu0 %v751_v27  ;;  %496 = vmatprep.subr.bf16.mxu1 %v752_v28  ;;  %v600_v19 = vadd.f32 %v599_v18, %v598_v17  ;;  %v141_v25 = vrot.slane %v136_v23, %v140_v22  ;;  %v145_v26 = vrot.slane %v136_v23, %v144_v24  ;;  %p905_p4 = scmp.ne.s32.totalorder %s616_s16, %s904_s17  ;;  %p910_p6 = scmp.lt.s32.totalorder %s904_s17, %s904_s17 }
  0x65   :  { %537 = vmatprep.subr.bf16.mxu0 %v754_v29  ;;  %572 = vadd.xlane.f32.xlu0 %v571_v12 }
  0x66   :  { %601 = vadd.xlane.f32.xlu1 %v600_v19  ;;  %p911_p7 = por %p910_p6, %p909_p5 }
  0x67   :  { %497 = vmatpush1.bf16.msra.mxu1 %v756_v30 }
  0x68   :  { %538 = vmatpush1.bf16.msra.mxu0 %v757_v31  ;;  %498 = vmatprep.subr.bf16.mxu1 %v758_v32  ;;  %p912_p8 = pnand %p911_p7, %p905_p4 }
  0x69   :  { %539 = vmatprep.subr.bf16.mxu0 %v760_v33 }
  0x6b   :  { %499 = vmatpush1.bf16.msra.mxu1 %v762_v34 }
  0x6c   :  { %540 = vmatpush1.bf16.msra.mxu0 %v763_v35  ;;  %500 = vmatprep.subr.bf16.mxu1 %v764_v36 }
  0x6d   :  { %541 = vmatprep.subr.bf16.mxu0 %v766_v37 }
  0x6f   :  { %501 = vmatpush1.bf16.msra.mxu1 %v768_v38 }
  0x70   :  { %542 = vmatpush1.bf16.msra.mxu0 %v769_v39  ;;  %502 = vmatprep.subr.bf16.mxu1 %v770_v40 }
  0x71   :  { %543 = vmatprep.subr.bf16.mxu0 %v772_v41 }
  0x73   :  { %503 = vmatpush1.bf16.msra.mxu1 %v774_v42 }
  0x74   :  { %544 = vmatpush1.bf16.msra.mxu0 %v775_v43  ;;  %504 = vmatprep.subr.bf16.mxu1 %v776_v44 }
  0x75   :  { %545 = vmatprep.subr.bf16.mxu0 %v778_v45 }
  0x77   :  { %505 = vmatpush1.bf16.msra.mxu1 %v780_v49 }
  0x78   :  { %546 = vmatpush1.bf16.msra.mxu0 %v781_v50  ;;  %506 = vmatprep.subr.bf16.mxu1 %v782_v52 }
  0x79   :  { %547 = vmatprep.subr.bf16.mxu0 %v784_v53 }
  0x7b   :  { %507 = vmatpush1.bf16.msra.mxu1 %v786_v54 }
  0x7c   :  { %548 = vmatpush1.bf16.msra.mxu0 %v787_v55  ;;  %508 = vmatprep.subr.bf16.mxu1 %v788_v56 }
  0x7d   :  { %549 = vmatprep.subr.bf16.mxu0 %v790_v57 }
  0x7f   :  { %509 = vmatpush1.bf16.msra.mxu1 %v792_v58 }
  0x80   :  { %550 = vmatpush1.bf16.msra.mxu0 %v793_v59  ;;  %510 = vmatprep.subr.bf16.mxu1 %v794_v60 }
  0x81   :  { %551 = vmatprep.subr.bf16.mxu0 %v796_v61 }
  0x83   :  { %511 = vmatpush1.bf16.msra.mxu1 %v798_v62 }
  0x84   :  { %552 = vmatpush1.bf16.msra.mxu0 %v799_v63  ;;  %512 = vmatprep.subr.bf16.mxu1 %v800_v0 }
  0x85   :  { %553 = vmatprep.subr.bf16.mxu0 %v802_v1 }
  0x87   :  { %513 = vmatpush1.bf16.msra.mxu1 %v804_v2 }
  0x88   :  { %554 = vmatpush1.bf16.msra.mxu0 %v805_v3 }
  0x8a   :  { %515 = vmatmul.mubr.bf16.vlgmr.msra.gmra.mrb[0].mxu1 %v629_v4 }
  0x8b   :  { %556 = vmatmul.mubr.bf16.vlgmr.msra.gmra.mrb[0].mxu0 %v631_v5 }
  0xf2   :  { %v573_v44 = vpop.xlane.xlu0 %572 }
  0xf3   :  { %v574_v45 = vmax.f32 %v573_v44, 1e-24  ;;  %v602_v46 = vpop.xlane.xlu1 %601 }
  0xf4   :  { %v603_v47 = vmax.f32 %v602_v46, 1e-24 }
  0xf5   :  { %810 = vrsqrt.f32 %v574_v45 }
  0xf6   :  { %812 = vrsqrt.f32 %v603_v47 }
  0xff   :  { %v811_v48 = vpop.eup %810 }
 0x100   :  { %v576_v49 = vmul.f32 %v811_v48, %v564_v6  ;;  %v577_v50 = vmul.f32 %v811_v48, %v565_v7  ;;  %v813_v51 = vpop.eup %812 }
 0x101   :  { %v605_v52 = vmul.f32 %v813_v51, %v594_v13  ;;  %v606_v53 = vmul.f32 %v813_v51, %v595_v14 }
 0x102   :  { %578 = vst [vmem:[#allocation10] sm:$0x3f] %v576_v49  ;;  %579 = vst [vmem:[#allocation10 + $0x8] sm:$0x3f] %v577_v50 }
 0x103   :  { %608 = vst [vmem:[#allocation10 + $0x20] sm:$0x3f] %v605_v52  ;;  %609 = vst [vmem:[#allocation10 + $0x28] sm:$0x3f] %v606_v53 }
 0x15d   :  { %v516_v27 = vpop.f32.mrb[0].mxu1 }
 0x15e   :  { %v557_v28 = vpop.f32.mrb[0].mxu0  ;;  %v517_v29 = vadd.f32 %v516_v27, %v141_v25  ;;  %v518_v30 = vpop.f32.mrb[1].mxu1 }
 0x15f   :  { %v559_v31 = vpop.f32.mrb[1].mxu0  ;;  %v519_v32 = vadd.f32 %v518_v30, %v145_v26  ;;  %v520_v33 = vpop.f32.mrb[2].mxu1 }
 0x160   :  { %v561_v34 = vpop.f32.mrb[2].mxu0  ;;  %v558_v35 = vadd.f32 %v557_v28, %v517_v29  ;;  %v521_v36 = vpop.f32.mrb[3].mxu1 }
 0x161   :  { %v562_v37 = vpop.f32.mrb[3].mxu0  ;;  %v560_v38 = vadd.f32 %v559_v31, %v519_v32 }
 0x162   :  { %v580_v39 = vmul.f32 %v558_v35, %v558_v35 }
 0x163   :  { %v581_v40 = vmul.f32 %v560_v38, %v560_v38 }
 0x164   :  { %v582_v41 = vsel %vm568_vm0, %v580_v39, 0.0 }
 0x165   :  { %v583_v42 = vsel %vm568_vm0, %v581_v40, 0.0 }
 0x166   :  { %v584_v43 = vadd.f32 %v583_v42, %v582_v41 }
 0x168   :  { %585 = vadd.xlane.f32.xlu0 %v584_v43 }
 0x1f5   :  { %v586_v54 = vpop.xlane.xlu0 %585 }
 0x1f6   :  { %v587_v55 = vmax.f32 %v586_v54, 1e-24 }
 0x1f8   :  { %814 = vrsqrt.f32 %v587_v55 }
 0x202   :  { %v815_v56 = vpop.eup %814 }
 0x203   :  { %v589_v57 = vmul.f32 %v815_v56, %v558_v35  ;;  %v590_v58 = vmul.f32 %v815_v56, %v560_v38 }
 0x205   :  { %592 = vst [vmem:[#allocation10 + $0x10] sm:$0x3f] %v589_v57  ;;  %593 = vst [vmem:[#allocation10 + $0x18] sm:$0x3f] %v590_v58 }
 0x206   :  { %915 = shalt.err (!%p912_p8)
}
 0x207   :  { %s916_s19 = scalar_lea.hbm %s1047_s5, 768 }
 0x208   :  { %p917_p9 = scmp.ne.s32.totalorder %s1047_s5, %s916_s19  ;;  %p920_p10 = scmp.lt.u32.totalorder %s916_s19, %s1047_s5 }
 0x20a   :  { %p922_p11 = pnand %p920_p10, %p917_p9 }
 0x20c   :  { %925 = shalt.err (!%p922_p11)
}
 0x20d   :  { %s941_s24 = smov 256   ;;  %s942_s25 = smov 16  }
 0x20e   :  { %621 = dma.vmem_to_hbm [thread:$0]  %s616_s16, 768, %s1047_s5, [#allocation4], %s941_s24, %s941_s24, %s942_s25  }
 0x20f   :  { %932 = dma.done.wait [#allocation4], 768  }
 0x210   :  { %933 = vsyncadd [#allocation4], 4294966528 }
 0x211   :  { %625 = vsyncpa [#allocation3], 1 }
 0x212   :  { %626 = vsyncpa [#allocation6], 1 }
 0x213   :  { %627 = vsyncpa [#allocation9], 1 }
 0x214   :  { %628 = vsyncpa [#allocation4], 1 }

</bundles_post_ra>
